<compile_context>
chip_gen: v6e
topology: v6e:2x2x1
jax: 0.10.0
libtpu: 0.0.40
codegen_flags: <defaults>
</compile_context>

<pallas_src>
import jax
import jax.numpy as jnp
from jax import lax
from jax.experimental import pallas as pl
from jax.experimental.pallas import tpu as pltpu

LANE = 128   # lane width
SUB = 8      # sublane rows per f32 vreg
CHUNK = 64   # rows per in-kernel accumulation chunk (and tr granularity)


def _tpu_kind():
    try:
        return jax.devices()[0].device_kind.lower()
    except Exception:
        return ""


_KIND = _tpu_kind()
_IS_V5E = ("v5 lite" in _KIND) or ("v5e" in _KIND) or ("v5litepod" in _KIND)
_IS_V7 = "v7" in _KIND

# Max row-tile: 4 inputs x 2 bufs x MAX_TR x 128 x 4B = 16 MiB at 4096
# (8 MiB at 2048). v5e keeps the smaller tile so it never needs more than its
# 16 MiB scoped-VMEM default even without the explicit limit bump below.
MAX_TR = 2048 if _IS_V5E else 4096
# Leading grid axis: shard disjoint row halves across the two TensorCores on
# v7x-class chips; keep it degenerate (size 1) on single-TC v5e/v6e so the
# per-step DMA stays as large as possible.
NCORES = 2 if _IS_V7 else 1


def _round_up(x, m):
    return ((x + m - 1) // m) * m


def _cdiv(a, b):
    return -(-a // b)


def _l1_grp_kernel(g1_ref, ir_ref, g2_ref, vis_ref, out_ref, acc_ref):
    """Accumulate per-lane partial sums of |g1-ir| and |g2-vis| over the
    inner (reduction) grid axis; emit the (2, 8, 128) partials per core."""
    i = pl.program_id(1)

    @pl.when(i == 0)
    def _init():
        acc_ref[...] = jnp.zeros_like(acc_ref)

    tr = g1_ref.shape[0]          # static block row count (multiple of CHUNK)
    n_chunks = tr // CHUNK

    def body(j, carry):
        a1, a2 = carry
        r = pl.multiple_of(j * CHUNK, CHUNK)
        # Stream in native dtype; upcast in-register only (no-op for f32,
        # halves HBM traffic if callers hand us bf16).
        d1 = jnp.abs(g1_ref[pl.ds(r, CHUNK), :].astype(jnp.float32)
                     - ir_ref[pl.ds(r, CHUNK), :].astype(jnp.float32))
        d2 = jnp.abs(g2_ref[pl.ds(r, CHUNK), :].astype(jnp.float32)
                     - vis_ref[pl.ds(r, CHUNK), :].astype(jnp.float32))
        # (64, 128) -> (8, 8, 128) sum over leading axis: vreg-wise VPU adds
        # (the reshape never crosses an (8,128) tile boundary), no XLU reduce.
        a1 = a1 + jnp.sum(d1.reshape(-1, SUB, LANE), axis=0)
        a2 = a2 + jnp.sum(d2.reshape(-1, SUB, LANE), axis=0)
        return a1, a2

    zero = jnp.zeros((SUB, LANE), jnp.float32)
    a1, a2 = lax.fori_loop(0, n_chunks, body, (zero, zero), unroll=True)
    acc_ref[0] += a1
    acc_ref[1] += a2

    @pl.when(i == pl.num_programs(1) - 1)
    def _fini():
        out_ref[0] = acc_ref[...]


def reconstruction_loss_grp(im_group1_extract, im_group2_extract, im_ir, im_vis):
    """Pallas TPU implementation of ReconstructionLoss_grp.forward:
    L1Loss(g1, ir) + L1Loss(g2, vis), each with mean reduction."""
    n1 = int(im_group1_extract.size)
    n2 = int(im_group2_extract.size)
    assert int(im_ir.size) == n1 and int(im_vis.size) == n2

    total = max(n1, n2)
    # Minimal number of 128-lane rows, rounded to a sublane multiple.
    rows_min = _round_up(_cdiv(total, LANE), SUB)
    # Perf-review fix: derive the tile count first, then the tile size, so the
    # zero-padding is bounded by < CHUNK rows per tile (not a whole tile).
    tiles_per_core = _cdiv(rows_min, NCORES * MAX_TR)
    tr = _round_up(_cdiv(rows_min, NCORES * tiles_per_core), CHUNK)  # <= MAX_TR
    rows = NCORES * tiles_per_core * tr

    def to2d(x):
        flat = jnp.ravel(x)
        pad = rows * LANE - flat.shape[0]
        if pad:
            # Identical zero-pad per pair -> |0-0| = 0, means use true n1/n2.
            # TODO(synk): for ragged sizes this materializes one padded copy in
            # HBM; a manual-DMA (memory_space=pl.ANY) tail path would avoid it.
            flat = jnp.pad(flat, (0, pad))
        return flat.reshape(rows, LANE)

    g1_2d = to2d(im_group1_extract)
    ir_2d = to2d(im_ir)
    g2_2d = to2d(im_group2_extract)
    vis_2d = to2d(im_vis)

    tile_spec = pl.BlockSpec(
        (tr, LANE), lambda c, i, T=tiles_per_core: (c * T + i, 0))

    itemsize_sum = sum(x.dtype.itemsize for x in (g1_2d, ir_2d, g2_2d, vis_2d))
    in_bytes = rows * LANE * itemsize_sum
    out_bytes = NCORES * 2 * SUB * LANE * 4
    # Double-buffered input tiles + generous headroom for outputs/scratch.
    buf_bytes = 2 * tr * LANE * itemsize_sum
    vmem_limit = max(32 << 20, buf_bytes + (4 << 20))

    partials = pl.pallas_call(
        _l1_grp_kernel,
        out_shape=jax.ShapeDtypeStruct((NCORES, 2, SUB, LANE), jnp.float32),
        grid=(NCORES, tiles_per_core),
        in_specs=[tile_spec, tile_spec, tile_spec, tile_spec],
        out_specs=pl.BlockSpec((1, 2, SUB, LANE), lambda c, i: (c, 0, 0, 0)),
        scratch_shapes=[pltpu.VMEM((2, SUB, LANE), jnp.float32)],
        compiler_params=pltpu.CompilerParams(
            dimension_semantics=("parallel", "arbitrary"),
            vmem_limit_bytes=vmem_limit),
        cost_estimate=pl.CostEstimate(
            flops=6 * rows * LANE,
            transcendentals=0,
            bytes_accessed=in_bytes + out_bytes),
    )(g1_2d, ir_2d, g2_2d, vis_2d)

    # Tiny epilogue in XLA: collapse per-core per-lane partials, per-pair mean.
    pair_sums = jnp.sum(partials, axis=(0, 2, 3))  # (2,)
    return pair_sums[0] / jnp.float32(n1) + pair_sums[1] / jnp.float32(n2)


if __name__ == "__main__":
    key = jax.random.PRNGKey(0)
    k1, k2, k3, k4 = jax.random.split(key, 4)
    shape = (2, 4, 16, 16)  # N, C, H, W
    im_group1_extract = jax.random.normal(k1, shape, dtype=jnp.float32)
    im_group2_extract = jax.random.normal(k2, shape, dtype=jnp.float32)
    im_ir = jax.random.normal(k3, shape, dtype=jnp.float32)
    im_vis = jax.random.normal(k4, shape, dtype=jnp.float32)

    loss = reconstruction_loss_grp(
        im_group1_extract, im_group2_extract, im_ir, im_vis)
    loss = jax.block_until_ready(loss)

    # Reference check (L1Loss = mean absolute error, summed over the two pairs).
    ref = (jnp.mean(jnp.abs(im_group1_extract - im_ir))
           + jnp.mean(jnp.abs(im_group2_extract - im_vis)))
    assert jnp.allclose(loss, ref, rtol=1e-5, atol=1e-5), (loss, ref)

    # Extra check: shape not divisible by 8*128 (exercises the zero-pad path).
    shp2 = (3, 3, 17, 19)
    a = jax.random.normal(k1, shp2, dtype=jnp.float32)
    b = jax.random.normal(k2, shp2, dtype=jnp.float32)
    c = jax.random.normal(k3, shp2, dtype=jnp.float32)
    d = jax.random.normal(k4, shp2, dtype=jnp.float32)
    loss2 = jax.block_until_ready(reconstruction_loss_grp(a, b, c, d))
    ref2 = jnp.mean(jnp.abs(a - c)) + jnp.mean(jnp.abs(b - d))
    assert jnp.allclose(loss2, ref2, rtol=1e-5, atol=1e-5), (loss2, ref2)

    # Larger shape: exercises multi-tile reduction grid and the tr/rows
    # rounding (rows just over a tile multiple).
    shp3 = (4, 8, 130, 129)
    e = jax.random.normal(k1, shp3, dtype=jnp.float32)
    f = jax.random.normal(k2, shp3, dtype=jnp.float32)
    g = jax.random.normal(k3, shp3, dtype=jnp.float32)
    h = jax.random.normal(k4, shp3, dtype=jnp.float32)
    loss3 = jax.block_until_ready(reconstruction_loss_grp(e, f, g, h))
    ref3 = jnp.mean(jnp.abs(e - g)) + jnp.mean(jnp.abs(f - h))
    assert jnp.allclose(loss3, ref3, rtol=1e-5, atol=1e-5), (loss3, ref3)

    print("KERNEL_OK")
</pallas_src>

<mosaic_0001>
module attributes {stable_mosaic.version = 11 : i64} {
  func.func @_l1_grp_kernel(%arg0: i32, %arg1: i32, %arg2: memref<64x128xf32, #tpu.memory_space<vmem>>, %arg3: memref<64x128xf32, #tpu.memory_space<vmem>>, %arg4: memref<64x128xf32, #tpu.memory_space<vmem>>, %arg5: memref<64x128xf32, #tpu.memory_space<vmem>>, %arg6: memref<1x2x8x128xf32, #tpu.memory_space<vmem>>, %arg7: memref<2x8x128xf32, #tpu.memory_space<vmem>>) attributes {dimension_semantics = [#tpu.dimension_semantics<parallel>, #tpu.dimension_semantics<arbitrary>], iteration_bounds = array<i64: 1, 1>, scalar_prefetch = 0 : i64, scratch_operands = 1 : i64, tpu.core_type = #tpu.core_type<tc>, window_params = [{transform_indices = @transform_0, window_bounds = array<i64: 64, 128>}, {transform_indices = @transform_1, window_bounds = array<i64: 64, 128>}, {transform_indices = @transform_2, window_bounds = array<i64: 64, 128>}, {transform_indices = @transform_3, window_bounds = array<i64: 64, 128>}, {transform_indices = @transform_4, window_bounds = array<i64: 1, 2, 8, 128>}]} {
    %c0_i32 = arith.constant 0 : i32
    %0 = arith.cmpi eq, %arg1, %c0_i32 : i32
    %1 = arith.extui %0 : i1 to i32
    %c0_i32_0 = arith.constant 0 : i32
    %2 = arith.cmpi ne, %1, %c0_i32_0 : i32
    scf.if %2 {
      %cst_20 = arith.constant 0.000000e+00 : f32
      %39 = vector.broadcast %cst_20 : f32 to vector<2x8x128xf32>
      %c0_21 = arith.constant 0 : index
      %c0_22 = arith.constant 0 : index
      %c0_23 = arith.constant 0 : index
      %40 = vector.load %arg7[%c0_21, %c0_22, %c0_23] : memref<2x8x128xf32, #tpu.memory_space<vmem>>, vector<2x8x128xf32>
      tpu.vector_store %arg7[%c0_21, %c0_22, %c0_23], %39 {strides = array<i32>} : memref<2x8x128xf32, #tpu.memory_space<vmem>>, vector<2x8x128xf32>,
    } else {
    }
    %cst = arith.constant 0.000000e+00 : f32
    %3 = vector.broadcast %cst : f32 to vector<8x128xf32>
    %c0_i32_1 = arith.constant 0 : i32
    %c64_i32 = arith.constant 64 : i32
    %4 = arith.muli %c0_i32_1, %c64_i32 : i32
    %5 = tpu.assume_multiple %4, 64 : i32
    %6 = arith.index_cast %5 : i32 to index
    %c0 = arith.constant 0 : index
    %7 = vector.load %arg2[%6, %c0] : memref<64x128xf32, #tpu.memory_space<vmem>>, vector<64x128xf32>
    %8 = arith.index_cast %5 : i32 to index
    %c0_2 = arith.constant 0 : index
    %9 = vector.load %arg3[%8, %c0_2] : memref<64x128xf32, #tpu.memory_space<vmem>>, vector<64x128xf32>
    %10 = arith.subf %7, %9 : vector<64x128xf32>
    %11 = math.absf %10 : vector<64x128xf32>
    %12 = arith.index_cast %5 : i32 to index
    %c0_3 = arith.constant 0 : index
    %13 = vector.load %arg4[%12, %c0_3] : memref<64x128xf32, #tpu.memory_space<vmem>>, vector<64x128xf32>
    %14 = arith.index_cast %5 : i32 to index
    %c0_4 = arith.constant 0 : index
    %15 = vector.load %arg5[%14, %c0_4] : memref<64x128xf32, #tpu.memory_space<vmem>>, vector<64x128xf32>
    %16 = arith.subf %13, %15 : vector<64x128xf32>
    %17 = math.absf %16 : vector<64x128xf32>
    %18 = vector.shape_cast %11 : vector<64x128xf32> to vector<8x8x128xf32>
    %cst_5 = arith.constant dense<0.000000e+00> : vector<8x128xf32>
    %19 = vector.multi_reduction <add>, %18, %cst_5 [0] : vector<8x8x128xf32> to vector<8x128xf32>
    %20 = arith.addf %3, %19 : vector<8x128xf32>
    %21 = vector.shape_cast %17 : vector<64x128xf32> to vector<8x8x128xf32>
    %cst_6 = arith.constant dense<0.000000e+00> : vector<8x128xf32>
    %22 = vector.multi_reduction <add>, %21, %cst_6 [0] : vector<8x8x128xf32> to vector<8x128xf32>
    %23 = arith.addf %3, %22 : vector<8x128xf32>
    %c1_i32 = arith.constant 1 : i32
    %c0_7 = arith.constant 0 : index
    %c0_8 = arith.constant 0 : index
    %c0_9 = arith.constant 0 : index
    %24 = vector.load %arg7[%c0_7, %c0_8, %c0_9] : memref<2x8x128xf32, #tpu.memory_space<vmem>>, vector<1x8x128xf32>
    %25 = vector.shape_cast %24 : vector<1x8x128xf32> to vector<8x128xf32>
    %26 = arith.addf %25, %20 : vector<8x128xf32>
    %c0_10 = arith.constant 0 : index
    %c0_11 = arith.constant 0 : index
    %c0_12 = arith.constant 0 : index
    %27 = vector.load %arg7[%c0_10, %c0_11, %c0_12] : memref<2x8x128xf32, #tpu.memory_space<vmem>>, vector<1x8x128xf32>
    %28 = vector.shape_cast %27 : vector<1x8x128xf32> to vector<8x128xf32>
    %29 = vector.shape_cast %26 : vector<8x128xf32> to vector<1x8x128xf32>
    tpu.vector_store %arg7[%c0_10, %c0_11, %c0_12], %29 {strides = array<i32>} : memref<2x8x128xf32, #tpu.memory_space<vmem>>, vector<1x8x128xf32>,
    %c1 = arith.constant 1 : index
    %c0_13 = arith.constant 0 : index
    %c0_14 = arith.constant 0 : index
    %30 = vector.load %arg7[%c1, %c0_13, %c0_14] : memref<2x8x128xf32, #tpu.memory_space<vmem>>, vector<1x8x128xf32>
    %31 = vector.shape_cast %30 : vector<1x8x128xf32> to vector<8x128xf32>
    %32 = arith.addf %31, %23 : vector<8x128xf32>
    %c1_15 = arith.constant 1 : index
    %c0_16 = arith.constant 0 : index
    %c0_17 = arith.constant 0 : index
    %33 = vector.load %arg7[%c1_15, %c0_16, %c0_17] : memref<2x8x128xf32, #tpu.memory_space<vmem>>, vector<1x8x128xf32>
    %34 = vector.shape_cast %33 : vector<1x8x128xf32> to vector<8x128xf32>
    %35 = vector.shape_cast %32 : vector<8x128xf32> to vector<1x8x128xf32>
    tpu.vector_store %arg7[%c1_15, %c0_16, %c0_17], %35 {strides = array<i32>} : memref<2x8x128xf32, #tpu.memory_space<vmem>>, vector<1x8x128xf32>,
    %c0_i32_18 = arith.constant 0 : i32
    %36 = arith.cmpi eq, %arg1, %c0_i32_18 : i32
    %37 = arith.extui %36 : i1 to i32
    %c0_i32_19 = arith.constant 0 : i32
    %38 = arith.cmpi ne, %37, %c0_i32_19 : i32
    scf.if %38 {
      %c0_20 = arith.constant 0 : index
      %c0_21 = arith.constant 0 : index
      %c0_22 = arith.constant 0 : index
      %39 = vector.load %arg7[%c0_20, %c0_21, %c0_22] : memref<2x8x128xf32, #tpu.memory_space<vmem>>, vector<2x8x128xf32>
      %c0_23 = arith.constant 0 : index
      %c0_24 = arith.constant 0 : index
      %c0_25 = arith.constant 0 : index
      %c0_26 = arith.constant 0 : index
      %40 = vector.load %arg6[%c0_23, %c0_24, %c0_25, %c0_26] : memref<1x2x8x128xf32, #tpu.memory_space<vmem>>, vector<1x2x8x128xf32>
      %41 = vector.shape_cast %40 : vector<1x2x8x128xf32> to vector<2x8x128xf32>
      %42 = vector.shape_cast %39 : vector<2x8x128xf32> to vector<1x2x8x128xf32>
      tpu.vector_store %arg6[%c0_23, %c0_24, %c0_25, %c0_26], %42 {strides = array<i32>} : memref<1x2x8x128xf32, #tpu.memory_space<vmem>>, vector<1x2x8x128xf32>,
    } else {
    }
    return
  }
  func.func @transform_0(%arg0: i32, %arg1: i32) -> (i32, i32) {
    %c1_i32 = arith.constant 1 : i32
    %0 = arith.muli %arg0, %c1_i32 : i32
    %1 = arith.addi %0, %arg1 : i32
    %c0_i32 = arith.constant 0 : i32
    %c0_i32_0 = arith.constant 0 : i32
    return %1, %c0_i32 : i32, i32
  }
  func.func @transform_1(%arg0: i32, %arg1: i32) -> (i32, i32) {
    %c1_i32 = arith.constant 1 : i32
    %0 = arith.muli %arg0, %c1_i32 : i32
    %1 = arith.addi %0, %arg1 : i32
    %c0_i32 = arith.constant 0 : i32
    %c0_i32_0 = arith.constant 0 : i32
    return %1, %c0_i32 : i32, i32
  }
  func.func @transform_2(%arg0: i32, %arg1: i32) -> (i32, i32) {
    %c1_i32 = arith.constant 1 : i32
    %0 = arith.muli %arg0, %c1_i32 : i32
    %1 = arith.addi %0, %arg1 : i32
    %c0_i32 = arith.constant 0 : i32
    %c0_i32_0 = arith.constant 0 : i32
    return %1, %c0_i32 : i32, i32
  }
  func.func @transform_3(%arg0: i32, %arg1: i32) -> (i32, i32) {
    %c1_i32 = arith.constant 1 : i32
    %0 = arith.muli %arg0, %c1_i32 : i32
    %1 = arith.addi %0, %arg1 : i32
    %c0_i32 = arith.constant 0 : i32
    %c0_i32_0 = arith.constant 0 : i32
    return %1, %c0_i32 : i32, i32
  }
  func.func @transform_4(%arg0: i32, %arg1: i32) -> (i32, i32, i32, i32) {
    %c0_i32 = arith.constant 0 : i32
    %c0_i32_0 = arith.constant 0 : i32
    %c0_i32_1 = arith.constant 0 : i32
    %c0_i32_2 = arith.constant 0 : i32
    return %arg0, %c0_i32, %c0_i32_0, %c0_i32_1 : i32, i32, i32, i32
  }
}

</mosaic_0001>

<bundles_post_ra>
// kernel: tpu_custom_call.1
= control target key start
LH: loop header
LB: loop body
LE: loop exit
PB: predicated region body
PF: predicated region fallthrough
CT: control target
= control target key end

     0   :  { %9 = vsyncpa [#allocation4], 0  ;;  %s393_s0 = inlined_call_operand.hbm [shape: f32[64,128], index: 0, kind: input, shape index: {}]   ;;  %s394_s1 = inlined_call_operand.hbm [shape: f32[64,128], index: 1, kind: input, shape index: {}]   ;;  %s395_s2 = inlined_call_operand.hbm [shape: f32[64,128], index: 2, kind: input, shape index: {}]   ;;  %s396_s3 = inlined_call_operand.hbm [shape: f32[64,128], index: 3, kind: input, shape index: {}]   ;;  %s397_s4 = inlined_call_operand.hbm [shape: f32[1,2,8,128], index: 4, kind: output, shape index: {}]  }
   0x1   :  { %10 = vsyncpa [#allocation7], 0 }
   0x2   :  { %11 = vsyncpa [#allocation10], 0 }
   0x3   :  { %12 = vsyncpa [#allocation5], 0  ;;  %s331_s15 = smov [#allocation6]   ;;  %s332_s17 = smov [#allocation3]  }
   0x4   :  { %s38_s16 = sshll.u32 %s331_s15, 4  ;;  %s22_s18 = sshll.u32 %s332_s17, 4  ;;  %s39_s16 = int_to_ptr.vmem [resolvable:$true] %s38_s16  ;;  %s23_s18 = int_to_ptr.vmem [resolvable:$true] %s22_s18 }
   0x5   :  { %s231_s19 = scalar_lea.vmem %s39_s16, 1024  ;;  %p236_p1 = scmp.lt.s32.totalorder %s39_s16, %s39_s16 }
   0x6   :  { %p232_p0 = scmp.ne.s32.totalorder %s39_s16, %s231_s19  ;;  %p237_p2 = scmp.lt.s32.totalorder %s231_s19, %s231_s19 }
   0x8   :  { %p238_p3 = por %p237_p2, %p236_p1 }
   0xa   :  { %p239_p4 = pnand %p238_p3, %p232_p0 }
   0xc   :  { %242 = shalt.err (!%p239_p4)
}
   0xd   :  { %s333_s20 = smov 128   ;;  %s334_s21 = smov 8  }
   0xe   :  { %44 = dma.hbm_to_vmem [thread:$0]  %s394_s1, 1024, %s39_s16, [#allocation7], %s333_s20, %s333_s20, %s334_s21  }
   0xf   :  { %s251_s24 = scalar_lea.vmem %s23_s18, 1024  ;;  %p256_p6 = scmp.lt.s32.totalorder %s23_s18, %s23_s18 }
  0x10   :  { %p252_p5 = scmp.ne.s32.totalorder %s23_s18, %s251_s24  ;;  %p257_p7 = scmp.lt.s32.totalorder %s251_s24, %s251_s24 }
  0x12   :  { %p258_p8 = por %p257_p7, %p256_p6 }
  0x14   :  { %p259_p9 = pnand %p258_p8, %p252_p5 }
  0x16   :  { %262 = shalt.err (!%p259_p9)
}
  0x17   :  { %28 = dma.hbm_to_vmem [thread:$0]  %s393_s0, 1024, %s23_s18, [#allocation4], %s333_s20, %s333_s20, %s334_s21  }
  0x18   :  { %s335_s27 = smov [#allocation8]   ;;  %s336_s29 = smov [#allocation9]  }
  0x19   :  { %s54_s28 = sshll.u32 %s335_s27, 4  ;;  %s70_s30 = sshll.u32 %s336_s29, 4  ;;  %s55_s28 = int_to_ptr.vmem [resolvable:$true] %s54_s28  ;;  %s71_s30 = int_to_ptr.vmem [resolvable:$true] %s70_s30 }
  0x1a   :  { %s271_s1 = scalar_lea.vmem %s55_s28, 1024  ;;  %p276_p11 = scmp.lt.s32.totalorder %s55_s28, %s55_s28 }
  0x1b   :  { %p272_p10 = scmp.ne.s32.totalorder %s55_s28, %s271_s1  ;;  %p277_p12 = scmp.lt.s32.totalorder %s271_s1, %s271_s1 }
  0x1d   :  { %p278_p13 = por %p277_p12, %p276_p11 }
  0x1f   :  { %p279_p0 = pnand %p278_p13, %p272_p10 }
  0x21   :  { %282 = shalt.err (!%p279_p0)
}
  0x22   :  { %60 = dma.hbm_to_vmem [thread:$0]  %s395_s2, 1024, %s55_s28, [#allocation7], %s333_s20, %s333_s20, %s334_s21  }
  0x23   :  { %s291_s0 = scalar_lea.vmem %s71_s30, 1024  ;;  %p296_p2 = scmp.lt.s32.totalorder %s71_s30, %s71_s30 }
  0x24   :  { %p292_p1 = scmp.ne.s32.totalorder %s71_s30, %s291_s0  ;;  %p297_p3 = scmp.lt.s32.totalorder %s291_s0, %s291_s0 }
  0x26   :  { %p298_p4 = por %p297_p3, %p296_p2 }
  0x28   :  { %p299_p5 = pnand %p298_p4, %p292_p1 }
  0x2a   :  { %302 = shalt.err (!%p299_p5)
}
  0x2b   :  { %76 = dma.hbm_to_vmem [thread:$0]  %s396_s3, 1024, %s71_s30, [#allocation10], %s333_s20, %s333_s20, %s334_s21  }
  0x2c   :  { %323 = dma.done.wait [#allocation4], 1024  }
  0x2d   :  { %324 = vsyncadd [#allocation4], 4294966272 }
  0x2e   :  { %325 = dma.done.wait [#allocation7], 2048  }
  0x2f   :  { %326 = vsyncadd [#allocation7], 4294965248 }
  0x30   :  { %327 = dma.done.wait [#allocation10], 1024  }
  0x31   :  { %328 = vsyncadd [#allocation10], 4294966272  ;;  %v103_v0 = vld [vmem:[#allocation3] sm:$0xff]  ;;  %v104_v1 = vld [vmem:[#allocation3 + $0x8] sm:$0xff]  ;;  %s337_s2 = smov [#allocation11]  }
  0x32   :  { %v105_v2 = vld [vmem:[#allocation3 + $0x10] sm:$0xff]  ;;  %v106_v3 = vld [vmem:[#allocation3 + $0x18] sm:$0xff]  ;;  %v107_v4 = vld [vmem:[#allocation3 + $0x20] sm:$0xff]  ;;  %s202_s3 = sshll.u32 %s337_s2, 4  ;;  %s203_s3 = int_to_ptr.vmem [resolvable:$true] %s202_s3 }
  0x33   :  { %v111_v5 = vld [vmem:[#allocation6] sm:$0xff]  ;;  %v112_v6 = vld [vmem:[#allocation6 + $0x8] sm:$0xff]  ;;  %v113_v7 = vld [vmem:[#allocation6 + $0x10] sm:$0xff]  ;;  %s303_s9 = scalar_lea.vmem %s203_s3, 256  ;;  %p308_p7 = scmp.lt.s32.totalorder %s203_s3, %s203_s3 }
  0x34   :  { %v114_v8 = vld [vmem:[#allocation6 + $0x18] sm:$0xff]  ;;  %v119_v9 = vsub.f32 %v103_v0, %v111_v5  ;;  %v115_v10 = vld [vmem:[#allocation6 + $0x20] sm:$0xff]  ;;  %v120_v11 = vsub.f32 %v104_v1, %v112_v6  ;;  %v121_v12 = vsub.f32 %v105_v2, %v113_v7  ;;  %v108_v14 = vld [vmem:[#allocation3 + $0x28] sm:$0xff]  ;;  %p304_p6 = scmp.ne.s32.totalorder %s203_s3, %s303_s9  ;;  %p309_p8 = scmp.lt.s32.totalorder %s303_s9, %s303_s9 }
  0x35   :  { %v122_v13 = vsub.f32 %v106_v3, %v114_v8  ;;  %v116_v15 = vld [vmem:[#allocation6 + $0x28] sm:$0xff]  ;;  %v123_v17 = vsub.f32 %v107_v4, %v115_v10  ;;  %v109_v20 = vld [vmem:[#allocation3 + $0x30] sm:$0xff]  ;;  %v110_v21 = vld [vmem:[#allocation3 + $0x38] sm:$0xff] }
  0x36   :  { %v127_v16 = vand.u32 2147483647, %v119_v9  ;;  %v128_v18 = vand.u32 2147483647, %v120_v11  ;;  %v129_v19 = vand.u32 2147483647, %v121_v12  ;;  %v124_v23 = vsub.f32 %v108_v14, %v116_v15  ;;  %p310_p9 = por %p309_p8, %p308_p7 }
  0x37   :  { %v117_v22 = vld [vmem:[#allocation6 + $0x30] sm:$0xff]  ;;  %v130_v24 = vand.u32 2147483647, %v122_v13  ;;  %v135_v26 = vld [vmem:[#allocation8] sm:$0xff]  ;;  %v136_v27 = vld [vmem:[#allocation8 + $0x8] sm:$0xff] }
  0x38   :  { %v167_v25 = vadd.f32 %v128_v18, %v127_v16  ;;  %v137_v28 = vld [vmem:[#allocation8 + $0x10] sm:$0xff]  ;;  %v118_v29 = vld [vmem:[#allocation6 + $0x38] sm:$0xff]  ;;  %v139_v31 = vld [vmem:[#allocation8 + $0x20] sm:$0xff]  ;;  %v125_v32 = vsub.f32 %v109_v20, %v117_v22  ;;  %v131_v33 = vand.u32 2147483647, %v123_v17  ;;  %p311_p10 = pnand %p310_p9, %p304_p6 }
  0x39   :  { %v138_v30 = vld [vmem:[#allocation8 + $0x18] sm:$0xff]  ;;  %v143_v35 = vld [vmem:[#allocation9] sm:$0xff]  ;;  %v144_v36 = vld [vmem:[#allocation9 + $0x8] sm:$0xff]  ;;  %v126_v43 = vsub.f32 %v110_v21, %v118_v29  ;;  %v132_v44 = vand.u32 2147483647, %v124_v23 }
  0x3a   :  { %v168_v34 = vadd.f32 %v167_v25, %v129_v19  ;;  %v145_v37 = vld [vmem:[#allocation9 + $0x10] sm:$0xff]  ;;  %v146_v38 = vld [vmem:[#allocation9 + $0x18] sm:$0xff]  ;;  %v147_v39 = vld [vmem:[#allocation9 + $0x20] sm:$0xff]  ;;  %v151_v40 = vsub.f32 %v135_v26, %v143_v35  ;;  %v152_v41 = vsub.f32 %v136_v27, %v144_v36  ;;  %v133_v52 = vand.u32 2147483647, %v125_v32 }
  0x3b   :  { %v153_v42 = vsub.f32 %v137_v28, %v145_v37  ;;  %v140_v46 = vld [vmem:[#allocation8 + $0x28] sm:$0xff]  ;;  %v154_v48 = vsub.f32 %v138_v30, %v146_v38  ;;  %v155_v49 = vsub.f32 %v139_v31, %v147_v39  ;;  %v141_v54 = vld [vmem:[#allocation8 + $0x30] sm:$0xff]  ;;  %v134_v60 = vand.u32 2147483647, %v126_v43  ;;  %v142_v62 = vld [vmem:[#allocation8 + $0x38] sm:$0xff] }
  0x3c   :  { %v169_v45 = vadd.f32 %v168_v34, %v130_v24  ;;  %v148_v47 = vld [vmem:[#allocation9 + $0x28] sm:$0xff]  ;;  %v159_v50 = vand.u32 2147483647, %v151_v40  ;;  %v160_v51 = vand.u32 2147483647, %v152_v41  ;;  %v149_v55 = vld [vmem:[#allocation9 + $0x30] sm:$0xff] }
  0x3d   :  { %v161_v56 = vand.u32 2147483647, %v153_v42  ;;  %v156_v57 = vsub.f32 %v140_v46, %v148_v47  ;;  %v162_v58 = vand.u32 2147483647, %v154_v48  ;;  %v150_v63 = vld [vmem:[#allocation9 + $0x38] sm:$0xff]  ;;  %v157_v0 = vsub.f32 %v141_v54, %v149_v55 }
  0x3e   :  { %v170_v53 = vadd.f32 %v169_v45, %v131_v33  ;;  %v175_v59 = vadd.f32 %v160_v51, %v159_v50  ;;  %v163_v1 = vand.u32 2147483647, %v155_v49  ;;  %v158_v4 = vsub.f32 %v142_v62, %v150_v63 }
  0x3f   :  { %v164_v5 = vand.u32 2147483647, %v156_v57  ;;  %v165_v8 = vand.u32 2147483647, %v157_v0 }
  0x40   :  { %v171_v61 = vadd.f32 %v170_v53, %v132_v44  ;;  %v176_v2 = vadd.f32 %v175_v59, %v161_v56  ;;  %v166_v10 = vand.u32 2147483647, %v158_v4 }
  0x42   :  { %v172_v3 = vadd.f32 %v171_v61, %v133_v52  ;;  %v177_v6 = vadd.f32 %v176_v2, %v162_v58 }
  0x44   :  { %v173_v7 = vadd.f32 %v172_v3, %v134_v60  ;;  %v178_v9 = vadd.f32 %v177_v6, %v163_v1 }
  0x46   :  { %195 = vst [vmem:[#allocation11] sm:$0xff] %v173_v7  ;;  %v179_v11 = vadd.f32 %v178_v9, %v164_v5 }
  0x48   :  { %v180_v12 = vadd.f32 %v179_v11, %v165_v8 }
  0x4a   :  { %v181_v13 = vadd.f32 %v180_v12, %v166_v10 }
  0x4c   :  { %196 = vst [vmem:[#allocation11 + $0x8] sm:$0xff] %v181_v13 }
  0x4d   :  { %314 = shalt.err (!%p311_p10)
}
  0x4e   :  { %208 = dma.vmem_to_hbm [thread:$0]  %s203_s3, 256, %s397_s4, [#allocation5], %s333_s20, %s333_s20, %s334_s21  }
  0x4f   :  { %329 = dma.done.wait [#allocation5], 256  }
  0x50   :  { %330 = vsyncadd [#allocation5], 4294967040 }
  0x51   :  { %212 = vsyncpa [#allocation4], 1 }
  0x52   :  { %213 = vsyncpa [#allocation7], 1 }
  0x53   :  { %214 = vsyncpa [#allocation10], 1 }
  0x54   :  { %215 = vsyncpa [#allocation5], 1 }

</bundles_post_ra>
